<compile_context>
chip_gen: v7x
topology: tpu7x:2x2x1
jax: 0.10.0
libtpu: 0.0.40
codegen_flags: <defaults>
</compile_context>

<pallas_src>
import functools

import jax
import jax.numpy as jnp
from jax.experimental import pallas as pl
from jax.experimental.pallas import tpu as pltpu

_LANE = 128
_TARGET_TILE_BYTES = 2 * 1024 * 1024   # ~2 MiB per buffer
_SPLIT_THRESHOLD_ROWS = 1024           # split single-tile cases >= this many rows


def _threshold_relu_kernel(thr_ref, x_ref, o_ref):
    x = x_ref[...]
    thr = thr_ref[0].astype(x.dtype)
    zero = jnp.zeros_like(x)
    # Exactly the reference module's forward formula.
    o_ref[...] = jnp.maximum(x, zero) - jnp.maximum(x - thr, zero) + thr


def _round_up(n, m):
    return ((n + m - 1) // m) * m


def _rows_per_tile(rows, itemsize):
    """Pick the per-grid-step row tile.

    Multiple of the dtype's sublane packing, capped at ~_TARGET_TILE_BYTES per
    buffer; never shrinks to tiny tiles or grows into one giant block.
    """
    align = 8 * max(1, 4 // max(1, itemsize))          # 8 f32 / 16 bf16 / 32 int8
    target = max(align,
                 (_TARGET_TILE_BYTES // (_LANE * itemsize)) // align * align)
    if rows <= target:
        if rows >= _SPLIT_THRESHOLD_ROWS:
            # Two tiles so both v7x TensorCores are fed ("parallel" grid axis).
            return _round_up(pl.cdiv(rows, 2), align)
        return rows  # full-extent block: always legal, zero padding, grid == 1
    return target


@functools.partial(jax.jit, static_argnames=("donate_input",))
def threshold_relu(x, threshold=10.0, *, donate_input=False):
    """Apply the module's ThresholdReLU formula elementwise via Pallas on TPU."""
    orig_shape = x.shape
    dtype = x.dtype
    total = x.size

    # Lane-dense 2D slab. Reshape of a contiguous array is free; padding (with
    # its extra HBM copy) only happens if x.size is not a multiple of 128.
    needs_pad = total % _LANE != 0
    x_flat = jnp.ravel(x)
    if needs_pad:
        x_flat = jnp.pad(x_flat, (0, _LANE - total % _LANE))
    rows = x_flat.size // _LANE
    x2d = x_flat.reshape(rows, _LANE)

    tr = _rows_per_tile(rows, dtype.itemsize)
    grid = (pl.cdiv(rows, tr),)  # ragged last tile is masked by Pallas

    thr = jnp.asarray(threshold, dtype=jnp.float32).reshape(1)

    out2d = pl.pallas_call(
        _threshold_relu_kernel,
        out_shape=jax.ShapeDtypeStruct((rows, _LANE), dtype),
        grid_spec=pltpu.PrefetchScalarGridSpec(
            num_scalar_prefetch=0,
            grid=grid,
            in_specs=[
                pl.BlockSpec(memory_space=pltpu.MemorySpace.SMEM),  # threshold
                pl.BlockSpec((tr, _LANE), lambda i: (i, 0)),
            ],
            out_specs=pl.BlockSpec((tr, _LANE), lambda i: (i, 0)),
        ),
        compiler_params=pltpu.CompilerParams(
            dimension_semantics=("parallel",),
        ),
        # Optional buffer reuse if the caller can donate x (does not reduce
        # HBM traffic, only allocator pressure).
        input_output_aliases={1: 0} if donate_input else {},
    )(thr, x2d)

    out_flat = out2d.reshape(-1)
    if needs_pad:
        out_flat = out_flat[:total]
    return out_flat.reshape(orig_shape)


def threshold_relu_ref(x, threshold=10.0):
    zero = jnp.zeros_like(x)
    thr = jnp.asarray(threshold, dtype=x.dtype)
    return jnp.maximum(x, zero) - jnp.maximum(x - thr, zero) + thr


if __name__ == "__main__":
    key = jax.random.PRNGKey(0)
    # Small NCHW input consistent with typical conv-style usage.
    x = jax.random.normal(key, (2, 4, 16, 16), dtype=jnp.float32) * 8.0

    y = threshold_relu(x, 10.0)
    y = jax.block_until_ready(y)

    y_ref = threshold_relu_ref(x, 10.0)
    assert y.shape == x.shape and y.dtype == x.dtype
    assert jnp.allclose(y, y_ref, atol=1e-6, rtol=1e-6), "mismatch vs reference"

    print("KERNEL_OK")
</pallas_src>

<mosaic_0001>
module attributes {stable_mosaic.version = 11 : i64} {
  func.func @_threshold_relu_kernel(%arg0: i32, %arg1: memref<1xf32, #tpu.memory_space<smem>>, %arg2: memref<16x128xf32, #tpu.memory_space<vmem>>, %arg3: memref<16x128xf32, #tpu.memory_space<vmem>>) attributes {dimension_semantics = [#tpu.dimension_semantics<parallel>], iteration_bounds = array<i64: 1>, scalar_prefetch = 0 : i64, scratch_operands = 0 : i64, tpu.core_type = #tpu.core_type<tc>, window_params = [{transform_indices = @transform_0, window_bounds = array<i64: 1>}, {transform_indices = @transform_1, window_bounds = array<i64: 16, 128>}, {transform_indices = @transform_2, window_bounds = array<i64: 16, 128>}]} {
    %c0 = arith.constant 0 : index
    %c0_0 = arith.constant 0 : index
    %0 = vector.load %arg2[%c0, %c0_0] : memref<16x128xf32, #tpu.memory_space<vmem>>, vector<16x128xf32>
    %c0_1 = arith.constant 0 : index
    %1 = memref.load %arg1[%c0_1] : memref<1xf32, #tpu.memory_space<smem>>
    %cst = arith.constant 0.000000e+00 : f32
    %2 = vector.broadcast %cst : f32 to vector<16x128xf32>
    %3 = arith.maximumf %0, %2 : vector<16x128xf32>
    %4 = vector.broadcast %1 : f32 to vector<16x128xf32>
    %5 = arith.subf %0, %4 : vector<16x128xf32>
    %6 = arith.maximumf %5, %2 : vector<16x128xf32>
    %7 = arith.subf %3, %6 : vector<16x128xf32>
    %8 = vector.broadcast %1 : f32 to vector<16x128xf32>
    %9 = arith.addf %7, %8 : vector<16x128xf32>
    %c0_2 = arith.constant 0 : index
    %c0_3 = arith.constant 0 : index
    %10 = vector.load %arg3[%c0_2, %c0_3] : memref<16x128xf32, #tpu.memory_space<vmem>>, vector<16x128xf32>
    tpu.vector_store %arg3[%c0_2, %c0_3], %9 {strides = array<i32>} : memref<16x128xf32, #tpu.memory_space<vmem>>, vector<16x128xf32>,
    return
  }
  func.func @transform_0(%arg0: i32) -> i32 {
    %c0_i32 = arith.constant 0 : i32
    %c0_i32_0 = arith.constant 0 : i32
    return %c0_i32 : i32
  }
  func.func @transform_1(%arg0: i32) -> (i32, i32) {
    %c0_i32 = arith.constant 0 : i32
    %c0_i32_0 = arith.constant 0 : i32
    return %arg0, %c0_i32 : i32, i32
  }
  func.func @transform_2(%arg0: i32) -> (i32, i32) {
    %c0_i32 = arith.constant 0 : i32
    %c0_i32_0 = arith.constant 0 : i32
    return %arg0, %c0_i32 : i32, i32
  }
}

</mosaic_0001>

<bundles_post_ra>
// kernel: threshold_relu.1
= control target key start
LH: loop header
LB: loop body
LE: loop exit
PB: predicated region body
PF: predicated region fallthrough
CT: control target
= control target key end

     0   :  { %s62_s0 = inlined_call_operand.<no memory space> [shape: f32[1], index: 0, kind: input, shape index: {}]   ;;  %s63_s1 = inlined_call_operand.vmem [shape: f32[16,128], index: 1, kind: input, shape index: {}]   ;;  %s64_s2 = inlined_call_operand.vmem [shape: f32[16,128], index: 2, kind: output, shape index: {}]  }
   0x1   :  { %v12_v0 = vld [vmem:[%s63_s1] sm:$0xff]  ;;  %v17_v1 = vstv %s62_s0  ;;  %v13_v2 = vld [vmem:[%s63_s1 + $0x8] sm:$0xff] }
   0x2   :  { %v15_v3 = vmax.f32 %v12_v0, 0.0  ;;  %v18_v4 = vsub.f32 %v12_v0, %v17_v1  ;;  %v16_v5 = vmax.f32 %v13_v2, 0.0  ;;  %v19_v6 = vsub.f32 %v13_v2, %v17_v1 }
   0x4   :  { %v20_v7 = vmax.f32 %v18_v4, 0.0  ;;  %v21_v8 = vmax.f32 %v19_v6, 0.0 }
   0x6   :  { %v22_v9 = vsub.f32 %v15_v3, %v20_v7  ;;  %v23_v10 = vsub.f32 %v16_v5, %v21_v8 }
   0x8   :  { %v24_v11 = vadd.f32 %v22_v9, %v17_v1  ;;  %v25_v12 = vadd.f32 %v23_v10, %v17_v1 }
   0xa   :  { %26 = vst [vmem:[%s64_s2] sm:$0xff] %v24_v11  ;;  %27 = vst [vmem:[%s64_s2 + $0x8] sm:$0xff] %v25_v12 }

</bundles_post_ra>
